<compile_context>
chip_gen: v7x
topology: tpu7x:2x2x1
jax: 0.10.0
libtpu: 0.0.40
codegen_flags: <defaults>
</compile_context>

<pallas_src>
import functools

import jax
import jax.numpy as jnp
from jax.experimental import pallas as pl
from jax.experimental.pallas import tpu as pltpu


def _round_up(x, m):
    return ((x + m - 1) // m) * m


def _cdiv(a, b):
    return -(-a // b)


def _vmem_capacity_bytes():
    try:
        cap = getattr(pltpu.get_tpu_info(), "vmem_capacity_bytes", None)
        if cap:
            return int(cap)
    except Exception:
        pass
    return 64 * 1024 * 1024  # conservative floor (v7x per-TensorCore VMEM)


def _colsum_kernel(x_ref, o_ref, acc_ref, *, batch_rows, block_rows,
                   blocks_per_split, inv_batch, needs_mask):
    """Accumulate (1/B)-scaled column sums of this split's batch blocks."""
    p = pl.program_id(0)   # parallel split (maps to a TensorCore on v7x)
    i = pl.program_id(1)   # streaming (reduction) axis

    # Scratch is not zero-initialized; re-init at the start of every split.
    @pl.when(i == 0)
    def _init():
        acc_ref[...] = jnp.zeros_like(acc_ref)

    row0 = (p * blocks_per_split + i) * block_rows

    def _accum(x):
        # Accumulate in f32 without materializing an explicit f32 tile copy;
        # pre-scaling by 1/B keeps the accumulator well conditioned.
        acc_ref[...] += inv_batch * jnp.sum(
            x, axis=0, keepdims=True, dtype=jnp.float32)

    if needs_mask:
        # Fast path for fully in-range blocks: only a scalar compare per step.
        @pl.when(row0 + block_rows <= batch_rows)
        def _full_block():
            _accum(x_ref[...])

        # Ragged / fully-out-of-range blocks: mask rows past the true extent
        # (padded block contents are undefined and must never reach the sum).
        @pl.when(row0 + block_rows > batch_rows)
        def _ragged_block():
            x = x_ref[...]
            rows = row0 + jax.lax.broadcasted_iota(jnp.int32, x.shape, 0)
            _accum(jnp.where(rows < batch_rows, x, jnp.zeros_like(x)))
    else:
        _accum(x_ref[...])

    # Flush this split's partial-mean row on its last streaming step.
    @pl.when(i == blocks_per_split - 1)
    def _flush():
        o_ref[0] = acc_ref[...]


def _entropy_kernel(psum_ref, o_ref):
    """forward = -entropy(softmax(m)), m = sum of the partial-mean rows."""
    m = jnp.sum(psum_ref[...], axis=0, keepdims=True)     # (1, C) true mean
    mx = jnp.max(m, axis=-1, keepdims=True)
    z = m - mx
    e = jnp.exp(z)
    s = jnp.sum(e, axis=-1, keepdims=True)
    inv_s = pl.reciprocal(s, approx=False)                 # exact: loss value
    # -entropy = sum(p * log p) = sum(e*z)/s - log(s)
    o_ref[0, 0] = jnp.sum(e * z) * inv_s[0, 0] - jnp.log(s[0, 0])


def beloss(logits, *, block_rows=None, num_splits=2):
    """logits: (B, C). Returns scalar f32 loss = -entropy(softmax(mean_b logits))."""
    B, C = logits.shape
    itemsize = jnp.dtype(logits.dtype).itemsize
    sublane = {4: 8, 2: 16, 1: 32}.get(itemsize, 8)

    # Lane folding for C < 128: view (B, C) as (B//k, k*C), k = largest divisor
    # of B not exceeding 128//C.  Free (contiguous) reshape — no pad copy.
    k = 1
    if 0 < C < 128:
        for cand in range(max(1, 128 // C), 0, -1):
            if B % cand == 0:
                k = cand
                break
    b_f, c_f = B // k, k * C
    x = logits.reshape(b_f, c_f) if k > 1 else logits

    # Byte-budgeted block size, generation-aware (no fixed row cap).
    vmem_cap = _vmem_capacity_bytes()
    budget = max(vmem_cap // 8, 2 * 1024 * 1024)
    max_rows = _round_up(b_f, sublane)
    if block_rows is None:
        tb = budget // max(1, c_f * itemsize)
        tb = max((tb // sublane) * sublane, sublane)
        block_rows = min(tb, max_rows)
    else:
        block_rows = min(max(_round_up(int(block_rows), sublane), sublane),
                         max_rows)

    blocks_total = _cdiv(b_f, block_rows)
    num_splits = max(1, min(int(num_splits), blocks_total))
    bps = _cdiv(blocks_total, num_splits)
    needs_mask = (b_f % block_rows != 0) or (num_splits * bps != blocks_total)

    # Thin, very wide blocks: deepen the input pipeline to hide DMA latency.
    n_buffers = 3 if (block_rows <= 2 * sublane and bps >= 4) else 2

    lanes = _round_up(c_f, 128)
    vmem_limit = int(n_buffers * block_rows * lanes * itemsize   # input bufs
                     + 8 * lanes * 4                             # acc scratch
                     + 2 * 8 * lanes * 4                         # output bufs
                     + (4 << 20))                                # headroom

    kernel = functools.partial(
        _colsum_kernel, batch_rows=b_f, block_rows=block_rows,
        blocks_per_split=bps, inv_batch=1.0 / float(B), needs_mask=needs_mask)

    if n_buffers == 3:
        in_spec = pl.BlockSpec((block_rows, c_f),
                               lambda p, i, bps=bps: (p * bps + i, 0),
                               pipeline_mode=pl.Buffered(3))
    else:
        in_spec = pl.BlockSpec((block_rows, c_f),
                               lambda p, i, bps=bps: (p * bps + i, 0))

    partials = pl.pallas_call(
        kernel,
        out_shape=jax.ShapeDtypeStruct((num_splits, 1, c_f), jnp.float32),
        grid_spec=pltpu.PrefetchScalarGridSpec(
            num_scalar_prefetch=0,
            grid=(num_splits, bps),
            in_specs=[in_spec],
            # Per-split output row, resident across the streaming axis.
            out_specs=pl.BlockSpec((1, 1, c_f), lambda p, i: (p, 0, 0)),
            scratch_shapes=[pltpu.VMEM((1, c_f), jnp.float32)],
        ),
        compiler_params=pltpu.CompilerParams(
            dimension_semantics=("parallel", "arbitrary"),
            vmem_limit_bytes=vmem_limit,
        ),
    )(x)

    # Undo the lane fold (free reshape) and run the tiny entropy epilogue.
    rows = num_splits * k
    psum = partials.reshape(rows, C)
    out = pl.pallas_call(
        _entropy_kernel,
        out_shape=jax.ShapeDtypeStruct((1, 1), jnp.float32),
        grid_spec=pltpu.PrefetchScalarGridSpec(
            num_scalar_prefetch=0,
            grid=(1,),
            in_specs=[pl.BlockSpec((rows, C), lambda i: (0, 0))],
            out_specs=pl.BlockSpec((1, 1), lambda i: (0, 0)),
        ),
    )(psum)
    return out[0, 0]


def _beloss_ref(logits):
    """Pure-JAX reference matching the PyTorch module."""
    m = jnp.mean(logits.astype(jnp.float32), axis=0)
    p = jax.nn.softmax(m, axis=0)
    logp = jax.nn.log_softmax(m, axis=0)
    entropy = -jnp.sum(p * logp)
    return -entropy


if __name__ == "__main__":
    key1, key2, key3 = jax.random.split(jax.random.PRNGKey(0), 3)

    # Small shape consistent with the module: batch=8, classes=32, f32.
    # Exercises lane folding (C=32 -> k=4, C_f=128) and the padded/masked tile.
    B, C = 8, 32
    logits = jax.random.normal(key1, (B, C), dtype=jnp.float32)
    out = beloss(logits)
    jax.block_until_ready(out)
    ref = _beloss_ref(logits)
    assert jnp.allclose(out, ref, atol=1e-5, rtol=1e-5), (out, ref)

    # bf16, dual-split parallel axis, ragged (masked) last block.
    B2, C2 = 20, 128
    logits2 = jax.random.normal(key2, (B2, C2), dtype=jnp.bfloat16)
    out2 = beloss(logits2, block_rows=16)
    jax.block_until_ready(out2)
    ref2 = _beloss_ref(logits2)
    assert jnp.allclose(out2, ref2, atol=1e-4, rtol=1e-4), (out2, ref2)

    # f32 with lane folding + multi-block streaming per split + a fully
    # out-of-range trailing block on the second split (must be masked out).
    B3, C3 = 272, 64
    logits3 = jax.random.normal(key3, (B3, C3), dtype=jnp.float32)
    out3 = beloss(logits3, block_rows=64)
    jax.block_until_ready(out3)
    ref3 = _beloss_ref(logits3)
    assert jnp.allclose(out3, ref3, atol=1e-4, rtol=1e-4), (out3, ref3)

    print("KERNEL_OK")
</pallas_src>

<mosaic_0001>
module attributes {stable_mosaic.version = 11 : i64} {
  func.func @_colsum_kernel(%arg0: i32, %arg1: i32, %arg2: memref<8x128xf32, #tpu.memory_space<vmem>>, %arg3: memref<1x1x128xf32, #tpu.memory_space<vmem>>, %arg4: memref<1x128xf32, #tpu.memory_space<vmem>>) attributes {dimension_semantics = [#tpu.dimension_semantics<parallel>, #tpu.dimension_semantics<arbitrary>], iteration_bounds = array<i64: 1, 1>, scalar_prefetch = 0 : i64, scratch_operands = 1 : i64, tpu.core_type = #tpu.core_type<tc>, window_params = [{transform_indices = @transform_0, window_bounds = array<i64: 8, 128>}, {transform_indices = @transform_1, window_bounds = array<i64: 1, 1, 128>}]} {
    %c0_i32 = arith.constant 0 : i32
    %0 = arith.cmpi eq, %arg1, %c0_i32 : i32
    %1 = arith.extui %0 : i1 to i32
    %c0_i32_0 = arith.constant 0 : i32
    %2 = arith.cmpi ne, %1, %c0_i32_0 : i32
    scf.if %2 {
      %cst = arith.constant 0.000000e+00 : f32
      %17 = vector.broadcast %cst : f32 to vector<1x128xf32>
      %c0 = arith.constant 0 : index
      %c0_8 = arith.constant 0 : index
      %18 = vector.load %arg4[%c0, %c0_8] : memref<1x128xf32, #tpu.memory_space<vmem>>, vector<1x128xf32>
      tpu.vector_store %arg4[%c0, %c0_8], %17 {strides = array<i32>} : memref<1x128xf32, #tpu.memory_space<vmem>>, vector<1x128xf32>,
    } else {
    }
    %c1_i32 = arith.constant 1 : i32
    %3 = arith.muli %arg0, %c1_i32 : i32
    %4 = arith.addi %3, %arg1 : i32
    %c8_i32 = arith.constant 8 : i32
    %5 = arith.muli %4, %c8_i32 : i32
    %c8_i32_1 = arith.constant 8 : i32
    %6 = arith.addi %5, %c8_i32_1 : i32
    %c2_i32 = arith.constant 2 : i32
    %7 = arith.cmpi sle, %6, %c2_i32 : i32
    %8 = arith.extui %7 : i1 to i32
    %c0_i32_2 = arith.constant 0 : i32
    %9 = arith.cmpi ne, %8, %c0_i32_2 : i32
    scf.if %9 {
      %c0 = arith.constant 0 : index
      %c0_8 = arith.constant 0 : index
      %17 = vector.load %arg2[%c0, %c0_8] : memref<8x128xf32, #tpu.memory_space<vmem>>, vector<8x128xf32>
      %c0_9 = arith.constant 0 : index
      %c0_10 = arith.constant 0 : index
      %18 = vector.load %arg4[%c0_9, %c0_10] : memref<1x128xf32, #tpu.memory_space<vmem>>, vector<1x128xf32>
      %cst = arith.constant dense<0.000000e+00> : vector<128xf32>
      %19 = vector.multi_reduction <add>, %17, %cst [0] : vector<8x128xf32> to vector<128xf32>
      %20 = vector.shape_cast %19 : vector<128xf32> to vector<1x128xf32>
      %cst_11 = arith.constant 1.250000e-01 : f32
      %21 = vector.broadcast %cst_11 : f32 to vector<1x128xf32>
      %22 = arith.mulf %21, %20 : vector<1x128xf32>
      %23 = arith.addf %18, %22 : vector<1x128xf32>
      %c0_12 = arith.constant 0 : index
      %c0_13 = arith.constant 0 : index
      %24 = vector.load %arg4[%c0_12, %c0_13] : memref<1x128xf32, #tpu.memory_space<vmem>>, vector<1x128xf32>
      tpu.vector_store %arg4[%c0_12, %c0_13], %23 {strides = array<i32>} : memref<1x128xf32, #tpu.memory_space<vmem>>, vector<1x128xf32>,
    } else {
    }
    %c8_i32_3 = arith.constant 8 : i32
    %10 = arith.addi %5, %c8_i32_3 : i32
    %c2_i32_4 = arith.constant 2 : i32
    %11 = arith.cmpi sgt, %10, %c2_i32_4 : i32
    %12 = arith.extui %11 : i1 to i32
    %c0_i32_5 = arith.constant 0 : i32
    %13 = arith.cmpi ne, %12, %c0_i32_5 : i32
    scf.if %13 {
      %c0 = arith.constant 0 : index
      %c0_8 = arith.constant 0 : index
      %17 = vector.load %arg2[%c0, %c0_8] : memref<8x128xf32, #tpu.memory_space<vmem>>, vector<8x128xf32>
      %18 = tpu.iota {dimensions = array<i32: 0>} : vector<8x128xi32>
      %19 = vector.broadcast %5 : i32 to vector<8x128xi32>
      %20 = arith.addi %19, %18 : vector<8x128xi32>
      %c2_i32_9 = arith.constant 2 : i32
      %21 = vector.broadcast %c2_i32_9 : i32 to vector<8x128xi32>
      %22 = arith.cmpi slt, %20, %21 : vector<8x128xi32>
      %cst = arith.constant 0.000000e+00 : f32
      %23 = vector.broadcast %cst : f32 to vector<8x128xf32>
      %24 = arith.select %22, %17, %23 : vector<8x128xi1>, vector<8x128xf32>
      %c0_10 = arith.constant 0 : index
      %c0_11 = arith.constant 0 : index
      %25 = vector.load %arg4[%c0_10, %c0_11] : memref<1x128xf32, #tpu.memory_space<vmem>>, vector<1x128xf32>
      %cst_12 = arith.constant dense<0.000000e+00> : vector<128xf32>
      %26 = vector.multi_reduction <add>, %24, %cst_12 [0] : vector<8x128xf32> to vector<128xf32>
      %27 = vector.shape_cast %26 : vector<128xf32> to vector<1x128xf32>
      %cst_13 = arith.constant 1.250000e-01 : f32
      %28 = vector.broadcast %cst_13 : f32 to vector<1x128xf32>
      %29 = arith.mulf %28, %27 : vector<1x128xf32>
      %30 = arith.addf %25, %29 : vector<1x128xf32>
      %c0_14 = arith.constant 0 : index
      %c0_15 = arith.constant 0 : index
      %31 = vector.load %arg4[%c0_14, %c0_15] : memref<1x128xf32, #tpu.memory_space<vmem>>, vector<1x128xf32>
      tpu.vector_store %arg4[%c0_14, %c0_15], %30 {strides = array<i32>} : memref<1x128xf32, #tpu.memory_space<vmem>>, vector<1x128xf32>,
    } else {
    }
    %c0_i32_6 = arith.constant 0 : i32
    %14 = arith.cmpi eq, %arg1, %c0_i32_6 : i32
    %15 = arith.extui %14 : i1 to i32
    %c0_i32_7 = arith.constant 0 : i32
    %16 = arith.cmpi ne, %15, %c0_i32_7 : i32
    scf.if %16 {
      %c0 = arith.constant 0 : index
      %c0_8 = arith.constant 0 : index
      %17 = vector.load %arg4[%c0, %c0_8] : memref<1x128xf32, #tpu.memory_space<vmem>>, vector<1x128xf32>
      %c0_9 = arith.constant 0 : index
      %c0_10 = arith.constant 0 : index
      %c0_11 = arith.constant 0 : index
      %18 = vector.load %arg3[%c0_9, %c0_10, %c0_11] : memref<1x1x128xf32, #tpu.memory_space<vmem>>, vector<1x1x128xf32>
      %19 = vector.shape_cast %18 : vector<1x1x128xf32> to vector<1x128xf32>
      %20 = vector.shape_cast %17 : vector<1x128xf32> to vector<1x1x128xf32>
      tpu.vector_store %arg3[%c0_9, %c0_10, %c0_11], %20 {strides = array<i32>} : memref<1x1x128xf32, #tpu.memory_space<vmem>>, vector<1x1x128xf32>,
    } else {
    }
    return
  }
  func.func @transform_0(%arg0: i32, %arg1: i32) -> (i32, i32) {
    %c1_i32 = arith.constant 1 : i32
    %0 = arith.muli %arg0, %c1_i32 : i32
    %1 = arith.addi %0, %arg1 : i32
    %c0_i32 = arith.constant 0 : i32
    %c0_i32_0 = arith.constant 0 : i32
    return %1, %c0_i32 : i32, i32
  }
  func.func @transform_1(%arg0: i32, %arg1: i32) -> (i32, i32, i32) {
    %c0_i32 = arith.constant 0 : i32
    %c0_i32_0 = arith.constant 0 : i32
    %c0_i32_1 = arith.constant 0 : i32
    return %arg0, %c0_i32, %c0_i32_0 : i32, i32, i32
  }
}

</mosaic_0001>

<bundles_post_ra>
// kernel: tpu_custom_call.1
= control target key start
LH: loop header
LB: loop body
LE: loop exit
PB: predicated region body
PF: predicated region fallthrough
CT: control target
= control target key end

     0   :  { %6 = vsyncpa [#allocation4], 0  ;;  %s192_s0 = inlined_call_operand.hbm [shape: f32[2,128], index: 0, kind: input, shape index: {}]   ;;  %s193_s1 = inlined_call_operand.hbm [shape: f32[1,1,128], index: 1, kind: output, shape index: {}]  }
   0x1   :  { %7 = vsyncpa [#allocation5], 0 }
   0x2   :  { %16 = vsyncadd [#allocation4], 96  ;;  %s153_s6 = smov [#allocation3]   ;;  %s105_s10 = scalar_lea.hbm %s192_s0, 32 }
   0x3   :  { %s21_s7 = sshll.u32 %s153_s6, 4  ;;  %p106_p0 = scmp.ne.s32.totalorder %s192_s0, %s105_s10  ;;  %s22_s7 = int_to_ptr.vmem [resolvable:$true] %s21_s7 }
   0x4   :  { %p109_p1 = scmp.lt.u32.totalorder %s105_s10, %s192_s0 }
   0x6   :  { %p111_p2 = pnand %p109_p1, %p106_p0 }
   0x8   :  { %114 = shalt.err (!%p111_p2)
}
   0x9   :  { %s115_s15 = scalar_lea.vmem %s22_s7, 32  ;;  %s119_s16 = scalar_lea.vmem %s22_s7, 128 }
   0xa   :  { %p116_p3 = scmp.ne.s32.totalorder %s22_s7, %s115_s15  ;;  %p120_p4 = scmp.lt.s32.totalorder %s22_s7, %s22_s7 }
   0xb   :  { %p121_p5 = scmp.lt.s32.totalorder %s119_s16, %s115_s15 }
   0xd   :  { %p122_p6 = por %p121_p5, %p120_p4 }
   0xf   :  { %p123_p7 = pnand %p122_p6, %p116_p3 }
  0x11   :  { %126 = shalt.err (!%p123_p7)
}
  0x12   :  { %s154_s17 = smov 32   ;;  %s155_s18 = smov 2  }
  0x13   :  { %27 = dma.hbm_to_vmem [thread:$0]  %s192_s0, 32, %s22_s7, [#allocation4], %s154_s17, %s154_s17, %s155_s18  }
  0x14   :  { %149 = dma.done.wait [#allocation4], 128  }
  0x15   :  { %150 = vsyncadd [#allocation4], 4294967168  ;;  %v156_v0 = vmov 0.0   ;;  %v99_v1 = vld [vmem:[#allocation3] sm:$0x3]  ;;  %s157_s21 = smov [#allocation6]  }
  0x16   :  { %39 = vst [vmem:[#allocation2] sm:$0x1] %v156_v0  ;;  %v70_v2 = vrot.slane %v99_v1, 4  ;;  %s90_s22 = sshll.u32 %s157_s21, 4  ;;  %s91_s22 = int_to_ptr.vmem [resolvable:$true] %s90_s22 }
  0x17   :  { %s127_s0 = scalar_lea.vmem %s91_s22, 16  ;;  %s131_s23 = scalar_lea.vmem %s91_s22, 32 }
  0x18   :  { %v71_v3 = vadd.f32 %v99_v1, %v70_v2  ;;  %p128_p8 = scmp.ne.s32.totalorder %s91_s22, %s127_s0  ;;  %p132_p9 = scmp.lt.s32.totalorder %s91_s22, %s91_s22 }
  0x19   :  { %p133_p10 = scmp.lt.s32.totalorder %s131_s23, %s127_s0 }
  0x1a   :  { %v72_v4 = vrot.slane %v71_v3, 2 }
  0x1b   :  { %p134_p11 = por %p133_p10, %p132_p9 }
  0x1c   :  { %v73_v5 = vadd.f32 %v72_v4, %v71_v3 }
  0x1d   :  { %v69_v8 = vld [vmem:[#allocation2] sm:$0x1]  ;;  %p135_p12 = pnand %p134_p11, %p128_p8 }
  0x1e   :  { %v74_v6 = vrot.slane %v73_v5, 1 }
  0x20   :  { %v75_v7 = vadd.f32 %v74_v6, %v73_v5 }
  0x22   :  { %v76_v9 = vmul.f32 0.125, %v75_v7 }
  0x24   :  { %v77_v10 = vadd.f32 %v76_v9, %v69_v8 }
  0x26   :  { %78 = vst [vmem:[#allocation2] sm:$0x1] %v77_v10 }
  0x2d   :  { %v82_v11 = vld [vmem:[#allocation2] sm:$0x1] }
  0x2e   :  { %83 = vst [vmem:[#allocation6] sm:$0x1] %v82_v11 }
  0x2f   :  { %138 = shalt.err (!%p135_p12)
}
  0x30   :  { %s139_s26 = scalar_lea.hbm %s193_s1, 16 }
  0x31   :  { %p140_p13 = scmp.ne.s32.totalorder %s193_s1, %s139_s26  ;;  %p143_p0 = scmp.lt.u32.totalorder %s139_s26, %s193_s1 }
  0x33   :  { %p145_p1 = pnand %p143_p0, %p140_p13 }
  0x35   :  { %148 = shalt.err (!%p145_p1)
}
  0x36   :  { %93 = dma.vmem_to_hbm [thread:$0]  %s91_s22, 16, %s193_s1, [#allocation5]  }
  0x37   :  { %151 = dma.done.wait [#allocation5], 16  }
  0x38   :  { %152 = vsyncadd [#allocation5], 4294967280 }
  0x39   :  { %97 = vsyncpa [#allocation4], 1 }
  0x3a   :  { %98 = vsyncpa [#allocation5], 1 }

</bundles_post_ra>
